<compile_context>
chip_gen: v6e
topology: v6e:2x2x1
jax: 0.10.0
libtpu: 0.0.40
codegen_flags: <defaults>
</compile_context>

<pallas_src>
import jax
import jax.numpy as jnp
from jax.experimental import pallas as pl
from jax.experimental.pallas import tpu as pltpu

LANE = 128            # lane width of a vreg
SUBLANE = 8           # f32 sublane multiple
MAX_TILE_ROWS = 2048  # (2048, 128) f32 tile = 1 MiB per buffer
SMALL_N = 4096        # below this, plain fused XLA op beats kernel overhead


def _linear_kernel(wb_ref, x_ref, o_ref):
    # wb_ref: (2,) f32 in SMEM (scalar-prefetch): [weight, bias]
    # x_ref : (tile_rows, 128) f32 tile in VMEM
    # o_ref : (tile_rows, 128) f32 tile in VMEM
    w = wb_ref[0]
    b = wb_ref[1]
    o_ref[...] = x_ref[...] * w + b  # fused broadcasted multiply-add (VPU)


def _round_up(v, m):
    return ((v + m - 1) // m) * m


def linear_regression_forward(x, weight, bias):
    """x: (N, 1) f32, weight: (1, 1) f32, bias: (1,) f32 -> (N, 1) f32."""
    n, in_f = x.shape
    assert in_f == 1 and weight.shape == (1, 1) and bias.shape == (1,)
    assert x.dtype == jnp.float32, "kernel is tuned/validated for float32"
    dtype = x.dtype

    w = weight.astype(dtype)
    b = bias.astype(dtype)

    # Small-N fast path: launch/relayout overhead dominates; one fused XLA op.
    if n < SMALL_N:
        return x * w[0, 0] + b[0]

    # Pack scalar params for SMEM scalar-prefetch (no tiny per-step VMEM DMAs).
    wb = jnp.concatenate([w.reshape(-1), b.reshape(-1)])

    # Lane-dense re-layout: (N, 1) -> (rows, 128).  Pad only to a LANE multiple
    # (and only when ragged); the ragged last grid block is masked by Pallas.
    rows = pl.cdiv(n, LANE)
    n_lane = rows * LANE
    x_flat = x.reshape(-1)
    if n_lane != n:
        x_flat = jnp.pad(x_flat, (0, n_lane - n))
    x_slab = x_flat.reshape(rows, LANE)

    # Tile choice: as big as MAX_TILE_ROWS, but keep >= 2 grid steps so the
    # "parallel" axis can use both TensorCores on v7x.
    half_rows = _round_up(pl.cdiv(rows, 2), SUBLANE)
    tile_rows = max(SUBLANE, min(MAX_TILE_ROWS, half_rows))
    grid_rows = pl.cdiv(rows, tile_rows)

    y_slab = pl.pallas_call(
        _linear_kernel,
        out_shape=jax.ShapeDtypeStruct((rows, LANE), dtype),
        grid_spec=pltpu.PrefetchScalarGridSpec(
            num_scalar_prefetch=1,  # wb -> SMEM, passed positionally to index_maps
            grid=(grid_rows,),
            in_specs=[
                pl.BlockSpec((tile_rows, LANE), lambda i, wb: (i, 0)),
            ],
            out_specs=pl.BlockSpec((tile_rows, LANE), lambda i, wb: (i, 0)),
        ),
        compiler_params=pltpu.CompilerParams(
            dimension_semantics=("parallel",),  # shard row tiles across TCs (v7x)
        ),
        cost_estimate=pl.CostEstimate(
            flops=2 * n,
            transcendentals=0,
            bytes_accessed=2 * n * x.dtype.itemsize,  # one read + one write
        ),
    )(wb, x_slab)

    # Restore (N, 1) layout; slice only when we actually padded.
    y_flat = y_slab.reshape(-1)
    if n_lane != n:
        y_flat = y_flat[:n]
    return y_flat.reshape(n, 1)


if __name__ == "__main__":
    key = jax.random.PRNGKey(0)
    kx, kw, kb, kx2, kx3 = jax.random.split(key, 5)

    # Parameters with the same shapes as nn.Linear(1, 1).
    weight = jax.random.normal(kw, (1, 1), dtype=jnp.float32)  # (out=1, in=1)
    bias = jax.random.normal(kb, (1,), dtype=jnp.float32)      # (out=1,)

    # Small batch of scalar inputs (fast path), shape (8, 1) like torch would see.
    x = jax.random.normal(kx, (8, 1), dtype=jnp.float32)
    y = linear_regression_forward(x, weight, bias)
    jax.block_until_ready(y)
    y_ref = x @ weight.T + bias
    assert y.shape == (8, 1)
    assert jnp.allclose(y, y_ref, atol=1e-6), "mismatch vs reference (small)"

    # Lane-aligned case: zero-copy path (no pad, no slice), grid of 2 parallel tiles.
    n_aligned = 2048 * 128  # 262144
    x_al = jax.random.normal(kx2, (n_aligned, 1), dtype=jnp.float32)
    y_al = linear_regression_forward(x_al, weight, bias)
    jax.block_until_ready(y_al)
    y_al_ref = x_al @ weight.T + bias
    assert y_al.shape == (n_aligned, 1)
    assert jnp.allclose(y_al, y_al_ref, atol=1e-6), "mismatch vs reference (aligned)"

    # Ragged case: minimal LANE-pad, ragged last grid block masked by Pallas.
    x_big = jax.random.normal(kx3, (200_000, 1), dtype=jnp.float32)
    y_big = linear_regression_forward(x_big, weight, bias)
    jax.block_until_ready(y_big)
    y_big_ref = x_big @ weight.T + bias
    assert y_big.shape == (200_000, 1)
    assert jnp.allclose(y_big, y_big_ref, atol=1e-6), "mismatch vs reference (ragged)"

    print("KERNEL_OK")
</pallas_src>

<mosaic_0001>
module attributes {stable_mosaic.version = 11 : i64} {
  func.func @_linear_kernel(%arg0: i32, %arg1: memref<2xf32, #tpu.memory_space<smem>>, %arg2: memref<1024x128xf32, #tpu.memory_space<vmem>>, %arg3: memref<1024x128xf32, #tpu.memory_space<vmem>>) attributes {dimension_semantics = [#tpu.dimension_semantics<parallel>], iteration_bounds = array<i64: 2>, scalar_prefetch = 1 : i64, scratch_operands = 0 : i64, tpu.core_type = #tpu.core_type<tc>, window_params = [{transform_indices = @transform_0, window_bounds = array<i64: 1024, 128>}, {transform_indices = @transform_1, window_bounds = array<i64: 1024, 128>}]} {
    %c0 = arith.constant 0 : index
    %0 = memref.load %arg1[%c0] : memref<2xf32, #tpu.memory_space<smem>>
    %c1 = arith.constant 1 : index
    %1 = memref.load %arg1[%c1] : memref<2xf32, #tpu.memory_space<smem>>
    %c0_0 = arith.constant 0 : index
    %c0_1 = arith.constant 0 : index
    %2 = vector.load %arg2[%c0_0, %c0_1] : memref<1024x128xf32, #tpu.memory_space<vmem>>, vector<1024x128xf32>
    %3 = vector.broadcast %0 : f32 to vector<1024x128xf32>
    %4 = arith.mulf %2, %3 : vector<1024x128xf32>
    %5 = vector.broadcast %1 : f32 to vector<1024x128xf32>
    %6 = arith.addf %4, %5 : vector<1024x128xf32>
    %c0_2 = arith.constant 0 : index
    %c0_3 = arith.constant 0 : index
    %7 = vector.load %arg3[%c0_2, %c0_3] : memref<1024x128xf32, #tpu.memory_space<vmem>>, vector<1024x128xf32>
    tpu.vector_store %arg3[%c0_2, %c0_3], %6 {strides = array<i32>} : memref<1024x128xf32, #tpu.memory_space<vmem>>, vector<1024x128xf32>,
    return
  }
  func.func @transform_0(%arg0: i32, %arg1: memref<2xf32, #tpu.memory_space<smem>>) -> (i32, i32) {
    %c0_i32 = arith.constant 0 : i32
    %c0_i32_0 = arith.constant 0 : i32
    return %arg0, %c0_i32 : i32, i32
  }
  func.func @transform_1(%arg0: i32, %arg1: memref<2xf32, #tpu.memory_space<smem>>) -> (i32, i32) {
    %c0_i32 = arith.constant 0 : i32
    %c0_i32_0 = arith.constant 0 : i32
    return %arg0, %c0_i32 : i32, i32
  }
}

</mosaic_0001>

<bundles_post_ra>
// kernel: tpu_custom_call.1
= control target key start
LH: loop header
LB: loop body
LE: loop exit
PB: predicated region body
PF: predicated region fallthrough
CT: control target
= control target key end

     0   :  { %s917_s9 = smov [#allocation3]   ;;  %s1621_s0 = inlined_call_operand.hbm [shape: f32[2], index: 0, kind: input, shape index: {}]   ;;  %s1622_s1 = inlined_call_operand.hbm [shape: f32[2048,128], index: 1, kind: input, shape index: {}]   ;;  %s1623_s2 = inlined_call_operand.hbm [shape: f32[2048,128], index: 2, kind: output, shape index: {}]  }
   0x1   :  { %8 = dma.hbm_to_smem %s1621_s0, 16, %s917_s9, [#allocation2] }
   0x2   :  { %891 = dma.done.wait [#allocation2], 16 }
   0x3   :  { %892 = vsyncadd [#allocation2], 4294967280 }
   0x4   :  { %10 = sfence }
   0x5   :  { %11 = vsyncpa [#allocation5], 0 }
   0x6   :  { %13 = vsyncpa [#allocation5 + $0x1], 0 }
   0x7   :  { %14 = vsyncpa [#allocation6], 0 }
   0x8   :  { %16 = vsyncpa [#allocation6 + $0x1], 0  ;;  %s942_s12 = smov 0   ;;  %s944_s13 = smov 0  }
   0x9   :  { %s946_s14 = smov 0   ;;  %s948_s15 = smov 0  }
   0xa LB: > { %s963_s0 = sadd.s32 4294967295, %s915_s15   ;;  %s745_s16 = sadd.s32 4294967294, %s915_s15   ;;  %s915_s15 = sphi %s948_s15, %s1638_s15   ;;  %s911_s14 = sphi %s946_s14, %s1637_s14   ;;  %s907_s13 = sphi %s944_s13, %s1636_s13   ;;  %s903_s12 = sphi %s942_s12, %s1635_s12  }
   0xb   : > { %s967_s17 = sadd.s32 1, %s915_s15   ;;  %s29_s18 = sadd.s32 1, %s911_s14 }
   0xc   : > { %s26_s19 = ssub.s32 %s915_s15, %s967_s17  ;;  %p36_p0 = scmp.ne.s32.totalorder %s911_s14, %s907_s13 }
   0xd   : > { %p27_p1 = scmp.eq.s32.totalorder %s26_s19, 0  ;;  %p37_p2 = scmp.eq.s32.totalorder %s915_s15, 0 }
   0xe   : > { %p42_p3 = scmp.ne.s32.totalorder %s907_s13, %s903_s12  ;;  %p43_p4 = scmp.eq.s32.totalorder %s963_s0, 0 }
   0xf   : > { %s979_s20 = scalar_select %p27_p1, %s911_s14, %s29_s18  }
  0x10   : > { %p981_p5 = por %p37_p2, %p36_p0  ;;  %p985_p6 = por %p43_p4, %p42_p3 }
  0x11   : > { %p66_p7 = scmp.eq.s32.totalorder %s963_s0, 1  ;;  %p72_p8 = scmp.eq.s32.totalorder %s745_s16, 1 }
  0x12   : > { %s1627_s22 = scalar_select %p985_p6, 1, 0 }
  0x13   : > { %p774_p10 = scmp.lt.s32.totalorder %s915_s15, 2  ;;  %p992_p11 = por %p66_p7, %p36_p0 }
  0x14   : > { %p996_p12 = por %p72_p8, %p42_p3  ;;  %s92_s25 = sand.u32 1, %s911_s14  }
  0x15   : > { %s1628_s23 = scalar_select %p992_p11, 1, 0 }
  0x16   : > { %s1629_s24 = scalar_select %p996_p12, 1, 0 }
  0x17   : > { %s760_s26 = sshll.u32 %s915_s15, 14  ;;  %s748_s27 = sshll.u32 %s92_s25, 10 }
  0x18   : > { %s1005_s30 = scalar_lea.hbm %s1622_s1, %s760_s26  ;;  %s96_s3 = scalar_lea.vmem [#allocation4], %s748_s27 }
  0x19   : > { %s103_s4 = sshll.u32 %s96_s3, 4  ;;  %p1009_p13 = pnand %p774_p10, %p981_p5  ;;  %s1013_s4 = int_to_ptr.vmem [resolvable:$true] %s103_s4 }
  0x1a   : > { %s1015_s6 = scalar_lea.sflag [#allocation5], %s92_s25  ;;  %s821_s7 = scalar_lea.hbm %s1005_s30, 16384 }
  0x1b   : > { %p822_p0 = scmp.ne.s32.totalorder %s1005_s30, %s821_s7  ;;  %p823_p1 = pneg %p1009_p13 }
  0x1c   : > { %s826_s10 = scalar_lea.hbm %s1622_s1, 32768  ;;  %p827_p4 = scmp.lt.s32.totalorder %s1005_s30, %s1622_s1 }
  0x1d   : > { %p824_p2 = pnand %p823_p1, %p822_p0  ;;  %p828_p5 = scmp.lt.s32.totalorder %s826_s10, %s821_s7 }
  0x1f   : > { %p825_p3 = pneg %p824_p2  ;;  %p829_p7 = por %p828_p5, %p827_p4 }
  0x21   : > { %p830_p8 = pnand %p829_p7, %p825_p3 }
  0x23   : > { %833 = shalt.err (!%p830_p8)
}
  0x24   : > { %s834_s18 = scalar_lea.vmem %s1013_s4, 16384  ;;  %s918_s19 = smov [#allocation4]  }
  0x25   : > { %p835_p10 = scmp.ne.s32.totalorder %s1013_s4, %s834_s18  ;;  %s839_s21 = sshll.u32 %s918_s19, 4  ;;  %s840_s21 = int_to_ptr.vmem [resolvable:$false] %s839_s21 }
  0x26   : > { %s841_s25 = scalar_lea.vmem %s840_s21, 32768  ;;  %p842_p2 = scmp.lt.s32.totalorder %s1013_s4, %s840_s21 }
  0x27   : > { %p837_p9 = pnand %p835_p10, %p823_p1  ;;  %p843_p12 = scmp.lt.s32.totalorder %s841_s25, %s834_s18 }
  0x29   : > { %p838_p0 = pneg %p837_p9  ;;  %p844_p11 = por %p843_p12, %p842_p2 }
  0x2b   : > { %p845_p6 = pnand %p844_p11, %p838_p0 }
  0x2d   : > { %848 = shalt.err (!%p845_p6)
}
  0x2e   : > { %s919_s26 = smov 128   ;;  %s920_s27 = smov 8  }
  0x2f   : > { %769 = dma.hbm_to_vmem [thread:$0]  (!%p1009_p13), %s1005_s30, 16384, %s1013_s4, %s1015_s6, %s919_s26, %s919_s26, %s920_s27  }
  0x30   : > { %p751_p9 = scmp.ge.s32.totalorder %s915_s15, 1  ;;  %p111_p1 = scmp.lt.s32.totalorder %s915_s15, 3 }
  0x32   : > { %p112_p3 = pnand %p751_p9, %p111_p1 }
  0x33   : > { %s1039_s28 = sand.u32 (!%p112_p3), 1, %s907_s13   ;;  %p1631_p6 = scmp.ne.s32.totalorder (!%p112_p3), %s1627_s22, 0 }
  0x34   : > { %115 = sbr.rel (%p112_p3) target bundleno = 158 (0x9e), region = 24  ;;  %s752_s29 = sshll.u32 (!%p112_p3), %s1039_s28, 10 }
  0x35   : > { %s118_s3 = scalar_lea.sflag (!%p112_p3), [#allocation5], %s1039_s28  ;;  %s1045_s7 = scalar_lea.vmem (!%p112_p3), [#allocation4], %s752_s29 }
  0x39   : > { %894 = dma.done.wait (%p1631_p6), %s118_s3, 16384  }
  0x3a   : > { %896 = vsyncadd (%p1631_p6), %s118_s3, 4294950912  ;;  %s142_s30 = sld [smem:[#allocation3]]  ;;  %v144_v0 = vld [vmem:[%s1045_s7] sm:$0xff]  ;;  %v145_v2 = vld [vmem:[%s1045_s7 + $0x8] sm:$0xff]  ;;  %s1086_s22 = scalar_lea.vmem [#allocation7], %s752_s29 }
  0x3b   : > { %s754_s4 = sld [smem:[#allocation3 + $0x1]]  ;;  %v146_v3 = vld [vmem:[%s1045_s7 + $0x10] sm:$0xff]  ;;  %v147_v8 = vld [vmem:[%s1045_s7 + $0x18] sm:$0xff]  ;;  %v148_v9 = vld [vmem:[%s1045_s7 + $0x20] sm:$0xff]  ;;  %s761_s5 = sshll.u32 %s963_s0, 14 }
  0x3c   : > { %v149_v10 = vld [vmem:[%s1045_s7 + $0x28] sm:$0xff]  ;;  %v150_v14 = vld [vmem:[%s1045_s7 + $0x30] sm:$0xff]  ;;  %v151_v15 = vld [vmem:[%s1045_s7 + $0x38] sm:$0xff]  ;;  %s672_s6 = sshll.u32 %s1086_s22, 4  ;;  %s1570_s9 = scalar_lea.hbm %s1623_s2, %s761_s5  ;;  %s1576_s6 = int_to_ptr.vmem [resolvable:$true] %s672_s6 }
  0x3d   : > { %v152_v16 = vld [vmem:[%s1045_s7 + $0x40] sm:$0xff]  ;;  %v153_v21 = vld [vmem:[%s1045_s7 + $0x48] sm:$0xff]  ;;  %v154_v22 = vld [vmem:[%s1045_s7 + $0x50] sm:$0xff]  ;;  %s659_s10 = scalar_lea.sflag [#allocation6], %s1039_s28  ;;  %s849_s11 = scalar_lea.vmem %s1576_s6, 16384 }
  0x3e   : > { %v155_v23 = vld [vmem:[%s1045_s7 + $0x58] sm:$0xff]  ;;  %v156_v28 = vld [vmem:[%s1045_s7 + $0x60] sm:$0xff]  ;;  %v157_v29 = vld [vmem:[%s1045_s7 + $0x68] sm:$0xff]  ;;  %p850_p11 = scmp.ne.s32.totalorder %s1576_s6, %s849_s11  ;;  %p1632_p12 = scmp.ne.s32.totalorder %s1628_s23, 0 }
  0x3f   : > { %v158_v30 = vld [vmem:[%s1045_s7 + $0x70] sm:$0xff]  ;;  %v159_v35 = vld [vmem:[%s1045_s7 + $0x78] sm:$0xff]  ;;  %v160_v40 = vld [vmem:[%s1045_s7 + $0x80] sm:$0xff]  ;;  %s921_s16 = smov [#allocation7]  }
  0x40   : > { %v1052_v1 = vstv %s142_s30  ;;  %v161_v41 = vld [vmem:[%s1045_s7 + $0x88] sm:$0xff]  ;;  %v162_v42 = vld [vmem:[%s1045_s7 + $0x90] sm:$0xff]  ;;  %v163_v47 = vld [vmem:[%s1045_s7 + $0x98] sm:$0xff]  ;;  %p851_p13 = pnand %p850_p11, %p1632_p12  ;;  %s853_s18 = sshll.u32 %s921_s16, 4  ;;  %s854_s18 = int_to_ptr.vmem [resolvable:$false] %s853_s18 }
  0x41   : > { %v273_v4 = vmul.f32 %v1052_v1, %v144_v0  ;;  %v1057_v5 = vstv %s754_s4  ;;  %v274_v6 = vmul.f32 %v1052_v1, %v145_v2  ;;  %v275_v7 = vmul.f32 %v1052_v1, %v146_v3  ;;  %v164_v48 = vld [vmem:[%s1045_s7 + $0xa0] sm:$0xff]  ;;  %v165_v49 = vld [vmem:[%s1045_s7 + $0xa8] sm:$0xff]  ;;  %v166_v54 = vld [vmem:[%s1045_s7 + $0xb0] sm:$0xff]  ;;  %s855_s19 = scalar_lea.vmem %s854_s18, 32768  ;;  %p856_p5 = scmp.lt.s32.totalorder %s1576_s6, %s854_s18 }
  0x42   : > { %v276_v11 = vmul.f32 %v1052_v1, %v147_v8  ;;  %v277_v12 = vmul.f32 %v1052_v1, %v148_v9  ;;  %v278_v13 = vmul.f32 %v1052_v1, %v149_v10  ;;  %v279_v20 = vmul.f32 %v1052_v1, %v150_v14  ;;  %v167_v59 = vld [vmem:[%s1045_s7 + $0xb8] sm:$0xff]  ;;  %v168_v0 = vld [vmem:[%s1045_s7 + $0xc0] sm:$0xff]  ;;  %v169_v2 = vld [vmem:[%s1045_s7 + $0xc8] sm:$0xff]  ;;  %p852_p4 = pneg %p851_p13  ;;  %p857_p7 = scmp.lt.s32.totalorder %s855_s19, %s849_s11 }
  0x43   : > { %v402_v17 = vadd.f32 %v1057_v5, %v273_v4  ;;  %v403_v18 = vadd.f32 %v1057_v5, %v274_v6  ;;  %v404_v19 = vadd.f32 %v1057_v5, %v275_v7  ;;  %v280_v27 = vmul.f32 %v1052_v1, %v151_v15  ;;  %v170_v3 = vld [vmem:[%s1045_s7 + $0xd0] sm:$0xff]  ;;  %v171_v9 = vld [vmem:[%s1045_s7 + $0xd8] sm:$0xff]  ;;  %v172_v10 = vld [vmem:[%s1045_s7 + $0xe0] sm:$0xff] }
  0x44   : > { %v405_v24 = vadd.f32 %v1057_v5, %v276_v11  ;;  %v406_v25 = vadd.f32 %v1057_v5, %v277_v12  ;;  %v407_v26 = vadd.f32 %v1057_v5, %v278_v13  ;;  %v408_v31 = vadd.f32 %v1057_v5, %v279_v20  ;;  %v173_v11 = vld [vmem:[%s1045_s7 + $0xe8] sm:$0xff]  ;;  %p858_p8 = por %p857_p7, %p856_p5 }
  0x45   : > { %530 = vst [vmem:[%s1086_s22] sm:$0xff] %v402_v17  ;;  %531 = vst [vmem:[%s1086_s22 + $0x8] sm:$0xff] %v403_v18  ;;  %v281_v32 = vmul.f32 %v1052_v1, %v152_v16  ;;  %v282_v33 = vmul.f32 %v1052_v1, %v153_v21  ;;  %v283_v34 = vmul.f32 %v1052_v1, %v154_v22  ;;  %v174_v16 = vld [vmem:[%s1045_s7 + $0xf0] sm:$0xff]  ;;  %v175_v21 = vld [vmem:[%s1045_s7 + $0xf8] sm:$0xff] }
  0x46   : > { %532 = vst [vmem:[%s1086_s22 + $0x10] sm:$0xff] %v404_v19  ;;  %533 = vst [vmem:[%s1086_s22 + $0x18] sm:$0xff] %v405_v24  ;;  %v409_v36 = vadd.f32 %v1057_v5, %v280_v27  ;;  %v284_v37 = vmul.f32 %v1052_v1, %v155_v23  ;;  %v285_v38 = vmul.f32 %v1052_v1, %v156_v28  ;;  %v177_v27 = vld [vmem:[%s1045_s7 + $0x108] sm:$0xff]  ;;  %v178_v28 = vld [vmem:[%s1045_s7 + $0x110] sm:$0xff]  ;;  %p859_p10 = pnand %p858_p8, %p852_p4 }
  0x47   : > { %534 = vst [vmem:[%s1086_s22 + $0x20] sm:$0xff] %v406_v25  ;;  %535 = vst [vmem:[%s1086_s22 + $0x28] sm:$0xff] %v407_v26  ;;  %v286_v39 = vmul.f32 %v1052_v1, %v157_v29  ;;  %v410_v43 = vadd.f32 %v1057_v5, %v281_v32  ;;  %v411_v44 = vadd.f32 %v1057_v5, %v282_v33  ;;  %v176_v26 = vld [vmem:[%s1045_s7 + $0x100] sm:$0xff]  ;;  %v179_v33 = vld [vmem:[%s1045_s7 + $0x118] sm:$0xff] }
  0x48   : > { %536 = vst [vmem:[%s1086_s22 + $0x30] sm:$0xff] %v408_v31  ;;  %v412_v45 = vadd.f32 %v1057_v5, %v283_v34  ;;  %v287_v46 = vmul.f32 %v1052_v1, %v158_v30  ;;  %537 = vst [vmem:[%s1086_s22 + $0x38] sm:$0xff] %v409_v36  ;;  %v413_v50 = vadd.f32 %v1057_v5, %v284_v37  ;;  %v180_v34 = vld [vmem:[%s1045_s7 + $0x120] sm:$0xff] }
  0x49   : > { %v414_v51 = vadd.f32 %v1057_v5, %v285_v38  ;;  %v415_v52 = vadd.f32 %v1057_v5, %v286_v39  ;;  %v288_v53 = vmul.f32 %v1052_v1, %v159_v35  ;;  %538 = vst [vmem:[%s1086_s22 + $0x40] sm:$0xff] %v410_v43  ;;  %539 = vst [vmem:[%s1086_s22 + $0x48] sm:$0xff] %v411_v44  ;;  %v181_v35 = vld [vmem:[%s1045_s7 + $0x128] sm:$0xff] }
  0x4a   : > { %540 = vst [vmem:[%s1086_s22 + $0x50] sm:$0xff] %v412_v45  ;;  %v416_v55 = vadd.f32 %v1057_v5, %v287_v46  ;;  %v289_v56 = vmul.f32 %v1052_v1, %v160_v40  ;;  %v290_v57 = vmul.f32 %v1052_v1, %v161_v41  ;;  %v291_v58 = vmul.f32 %v1052_v1, %v162_v42  ;;  %v182_v40 = vld [vmem:[%s1045_s7 + $0x130] sm:$0xff]  ;;  %v183_v45 = vld [vmem:[%s1045_s7 + $0x138] sm:$0xff] }
  0x4b   : > { %541 = vst [vmem:[%s1086_s22 + $0x58] sm:$0xff] %v413_v50  ;;  %542 = vst [vmem:[%s1086_s22 + $0x60] sm:$0xff] %v414_v51  ;;  %v417_v60 = vadd.f32 %v1057_v5, %v288_v53  ;;  %v292_v61 = vmul.f32 %v1052_v1, %v163_v47  ;;  %v293_v62 = vmul.f32 %v1052_v1, %v164_v48  ;;  %v184_v50 = vld [vmem:[%s1045_s7 + $0x140] sm:$0xff]  ;;  %v185_v51 = vld [vmem:[%s1045_s7 + $0x148] sm:$0xff] }
  0x4c   : > { %543 = vst [vmem:[%s1086_s22 + $0x68] sm:$0xff] %v415_v52  ;;  %v294_v63 = vmul.f32 %v1052_v1, %v165_v49  ;;  %544 = vst [vmem:[%s1086_s22 + $0x70] sm:$0xff] %v416_v55  ;;  %v418_v4 = vadd.f32 %v1057_v5, %v289_v56  ;;  %v419_v6 = vadd.f32 %v1057_v5, %v290_v57  ;;  %v186_v52 = vld [vmem:[%s1045_s7 + $0x150] sm:$0xff]  ;;  %v187_v57 = vld [vmem:[%s1045_s7 + $0x158] sm:$0xff] }
  0x4d   : > { %v420_v7 = vadd.f32 %v1057_v5, %v291_v58  ;;  %v295_v8 = vmul.f32 %v1052_v1, %v166_v54  ;;  %545 = vst [vmem:[%s1086_s22 + $0x78] sm:$0xff] %v417_v60  ;;  %v421_v12 = vadd.f32 %v1057_v5, %v292_v61  ;;  %v422_v13 = vadd.f32 %v1057_v5, %v293_v62  ;;  %v188_v58 = vld [vmem:[%s1045_s7 + $0x160] sm:$0xff] }
  0x4e   : > { %v423_v14 = vadd.f32 %v1057_v5, %v294_v63  ;;  %v296_v15 = vmul.f32 %v1052_v1, %v167_v59  ;;  %546 = vst [vmem:[%s1086_s22 + $0x80] sm:$0xff] %v418_v4  ;;  %547 = vst [vmem:[%s1086_s22 + $0x88] sm:$0xff] %v419_v6  ;;  %v297_v18 = vmul.f32 %v1052_v1, %v168_v0  ;;  %v189_v59 = vld [vmem:[%s1045_s7 + $0x168] sm:$0xff]  ;;  %v190_v0 = vld [vmem:[%s1045_s7 + $0x170] sm:$0xff] }
  0x4f   : > { %548 = vst [vmem:[%s1086_s22 + $0x90] sm:$0xff] %v420_v7  ;;  %v424_v17 = vadd.f32 %v1057_v5, %v295_v8  ;;  %v298_v19 = vmul.f32 %v1052_v1, %v169_v2  ;;  %v299_v20 = vmul.f32 %v1052_v1, %v170_v3  ;;  %549 = vst [vmem:[%s1086_s22 + $0x98] sm:$0xff] %v421_v12  ;;  %v191_v7 = vld [vmem:[%s1045_s7 + $0x178] sm:$0xff]  ;;  %v192_v12 = vld [vmem:[%s1045_s7 + $0x180] sm:$0xff] }
  0x50   : > { %550 = vst [vmem:[%s1086_s22 + $0xa0] sm:$0xff] %v422_v13  ;;  %551 = vst [vmem:[%s1086_s22 + $0xa8] sm:$0xff] %v423_v14  ;;  %v425_v22 = vadd.f32 %v1057_v5, %v296_v15  ;;  %v300_v23 = vmul.f32 %v1052_v1, %v171_v9  ;;  %v301_v24 = vmul.f32 %v1052_v1, %v172_v10  ;;  %v193_v13 = vld [vmem:[%s1045_s7 + $0x188] sm:$0xff]  ;;  %v194_v14 = vld [vmem:[%s1045_s7 + $0x190] sm:$0xff] }
  0x51   : > { %v302_v25 = vmul.f32 %v1052_v1, %v173_v11  ;;  %552 = vst [vmem:[%s1086_s22 + $0xb0] sm:$0xff] %v424_v17  ;;  %v426_v29 = vadd.f32 %v1057_v5, %v297_v18  ;;  %v427_v30 = vadd.f32 %v1057_v5, %v298_v19  ;;  %v428_v31 = vadd.f32 %v1057_v5, %v299_v20  ;;  %v195_v19 = vld [vmem:[%s1045_s7 + $0x198] sm:$0xff]  ;;  %v196_v20 = vld [vmem:[%s1045_s7 + $0x1a0] sm:$0xff] }
  0x52   : > { %v303_v32 = vmul.f32 %v1052_v1, %v174_v16  ;;  %553 = vst [vmem:[%s1086_s22 + $0xb8] sm:$0xff] %v425_v22  ;;  %v429_v36 = vadd.f32 %v1057_v5, %v300_v23  ;;  %v430_v37 = vadd.f32 %v1057_v5, %v301_v24  ;;  %v304_v39 = vmul.f32 %v1052_v1, %v175_v21  ;;  %v197_v21 = vld [vmem:[%s1045_s7 + $0x1a8] sm:$0xff] }
  0x53   : > { %v431_v38 = vadd.f32 %v1057_v5, %v302_v25  ;;  %554 = vst [vmem:[%s1086_s22 + $0xc0] sm:$0xff] %v426_v29  ;;  %555 = vst [vmem:[%s1086_s22 + $0xc8] sm:$0xff] %v427_v30  ;;  %v305_v42 = vmul.f32 %v1052_v1, %v176_v26  ;;  %v306_v43 = vmul.f32 %v1052_v1, %v177_v27  ;;  %v198_v26 = vld [vmem:[%s1045_s7 + $0x1b0] sm:$0xff] }
  0x54   : > { %556 = vst [vmem:[%s1086_s22 + $0xd0] sm:$0xff] %v428_v31  ;;  %v432_v41 = vadd.f32 %v1057_v5, %v303_v32  ;;  %v307_v44 = vmul.f32 %v1052_v1, %v178_v28  ;;  %557 = vst [vmem:[%s1086_s22 + $0xd8] sm:$0xff] %v429_v36  ;;  %v433_v46 = vadd.f32 %v1057_v5, %v304_v39  ;;  %v199_v31 = vld [vmem:[%s1045_s7 + $0x1b8] sm:$0xff]  ;;  %v200_v36 = vld [vmem:[%s1045_s7 + $0x1c0] sm:$0xff] }
  0x55   : > { %558 = vst [vmem:[%s1086_s22 + $0xe0] sm:$0xff] %v430_v37  ;;  %559 = vst [vmem:[%s1086_s22 + $0xe8] sm:$0xff] %v431_v38  ;;  %v308_v47 = vmul.f32 %v1052_v1, %v179_v33  ;;  %v309_v48 = vmul.f32 %v1052_v1, %v180_v34  ;;  %v310_v49 = vmul.f32 %v1052_v1, %v181_v35  ;;  %v201_v37 = vld [vmem:[%s1045_s7 + $0x1c8] sm:$0xff]  ;;  %v202_v38 = vld [vmem:[%s1045_s7 + $0x1d0] sm:$0xff] }
  0x56   : > { %560 = vst [vmem:[%s1086_s22 + $0xf0] sm:$0xff] %v432_v41  ;;  %v434_v53 = vadd.f32 %v1057_v5, %v305_v42  ;;  %v435_v54 = vadd.f32 %v1057_v5, %v306_v43  ;;  %v436_v55 = vadd.f32 %v1057_v5, %v307_v44  ;;  %v311_v56 = vmul.f32 %v1052_v1, %v182_v40  ;;  %v203_v43 = vld [vmem:[%s1045_s7 + $0x1d8] sm:$0xff]  ;;  %v204_v44 = vld [vmem:[%s1045_s7 + $0x1e0] sm:$0xff] }
  0x57   : > { %561 = vst [vmem:[%s1086_s22 + $0xf8] sm:$0xff] %v433_v46  ;;  %v437_v60 = vadd.f32 %v1057_v5, %v308_v47  ;;  %v438_v61 = vadd.f32 %v1057_v5, %v309_v48  ;;  %v439_v62 = vadd.f32 %v1057_v5, %v310_v49  ;;  %v312_v63 = vmul.f32 %v1052_v1, %v183_v45  ;;  %v205_v45 = vld [vmem:[%s1045_s7 + $0x1e8] sm:$0xff] }
  0x58   : > { %562 = vst [vmem:[%s1086_s22 + $0x100] sm:$0xff] %v434_v53  ;;  %563 = vst [vmem:[%s1086_s22 + $0x108] sm:$0xff] %v435_v54  ;;  %v440_v2 = vadd.f32 %v1057_v5, %v311_v56  ;;  %v313_v3 = vmul.f32 %v1052_v1, %v184_v50  ;;  %v314_v4 = vmul.f32 %v1052_v1, %v185_v51  ;;  %v206_v50 = vld [vmem:[%s1045_s7 + $0x1f0] sm:$0xff] }
  0x59   : > { %564 = vst [vmem:[%s1086_s22 + $0x110] sm:$0xff] %v436_v55  ;;  %v315_v6 = vmul.f32 %v1052_v1, %v186_v52  ;;  %565 = vst [vmem:[%s1086_s22 + $0x118] sm:$0xff] %v437_v60  ;;  %v441_v8 = vadd.f32 %v1057_v5, %v312_v63  ;;  %v316_v9 = vmul.f32 %v1052_v1, %v187_v57  ;;  %v207_v55 = vld [vmem:[%s1045_s7 + $0x1f8] sm:$0xff]  ;;  %v208_v60 = vld [vmem:[%s1045_s7 + $0x200] sm:$0xff] }
  0x5a   : > { %566 = vst [vmem:[%s1086_s22 + $0x120] sm:$0xff] %v438_v61  ;;  %567 = vst [vmem:[%s1086_s22 + $0x128] sm:$0xff] %v439_v62  ;;  %v317_v10 = vmul.f32 %v1052_v1, %v188_v58  ;;  %v318_v11 = vmul.f32 %v1052_v1, %v189_v59  ;;  %v442_v15 = vadd.f32 %v1057_v5, %v313_v3  ;;  %v209_v61 = vld [vmem:[%s1045_s7 + $0x208] sm:$0xff]  ;;  %v210_v62 = vld [vmem:[%s1045_s7 + $0x210] sm:$0xff] }
  0x5b   : > { %568 = vst [vmem:[%s1086_s22 + $0x130] sm:$0xff] %v440_v2  ;;  %v443_v16 = vadd.f32 %v1057_v5, %v314_v4  ;;  %v444_v17 = vadd.f32 %v1057_v5, %v315_v6  ;;  %v319_v18 = vmul.f32 %v1052_v1, %v190_v0  ;;  %569 = vst [vmem:[%s1086_s22 + $0x138] sm:$0xff] %v441_v8  ;;  %v211_v4 = vld [vmem:[%s1045_s7 + $0x218] sm:$0xff]  ;;  %v212_v6 = vld [vmem:[%s1045_s7 + $0x220] sm:$0xff] }
  0x5c   : > { %v445_v22 = vadd.f32 %v1057_v5, %v316_v9  ;;  %v446_v23 = vadd.f32 %v1057_v5, %v317_v10  ;;  %v447_v24 = vadd.f32 %v1057_v5, %v318_v11  ;;  %v320_v25 = vmul.f32 %v1052_v1, %v191_v7  ;;  %570 = vst [vmem:[%s1086_s22 + $0x140] sm:$0xff] %v442_v15  ;;  %v213_v7 = vld [vmem:[%s1045_s7 + $0x228] sm:$0xff] }
  0x5d   : > { %571 = vst [vmem:[%s1086_s22 + $0x148] sm:$0xff] %v443_v16  ;;  %572 = vst [vmem:[%s1086_s22 + $0x150] sm:$0xff] %v444_v17  ;;  %v448_v27 = vadd.f32 %v1057_v5, %v319_v18  ;;  %v321_v28 = vmul.f32 %v1052_v1, %v192_v12  ;;  %v322_v29 = vmul.f32 %v1052_v1, %v193_v13  ;;  %v214_v12 = vld [vmem:[%s1045_s7 + $0x230] sm:$0xff]  ;;  %v215_v17 = vld [vmem:[%s1045_s7 + $0x238] sm:$0xff] }
  0x5e   : > { %v323_v30 = vmul.f32 %v1052_v1, %v194_v14  ;;  %573 = vst [vmem:[%s1086_s22 + $0x158] sm:$0xff] %v445_v22  ;;  %574 = vst [vmem:[%s1086_s22 + $0x160] sm:$0xff] %v446_v23  ;;  %v449_v32 = vadd.f32 %v1057_v5, %v320_v25  ;;  %v324_v33 = vmul.f32 %v1052_v1, %v195_v19  ;;  %v216_v22 = vld [vmem:[%s1045_s7 + $0x240] sm:$0xff]  ;;  %v217_v23 = vld [vmem:[%s1045_s7 + $0x248] sm:$0xff] }
  0x5f   : > { %575 = vst [vmem:[%s1086_s22 + $0x168] sm:$0xff] %v447_v24  ;;  %v325_v34 = vmul.f32 %v1052_v1, %v196_v20  ;;  %v326_v35 = vmul.f32 %v1052_v1, %v197_v21  ;;  %576 = vst [vmem:[%s1086_s22 + $0x170] sm:$0xff] %v448_v27  ;;  %v450_v39 = vadd.f32 %v1057_v5, %v321_v28  ;;  %v218_v24 = vld [vmem:[%s1045_s7 + $0x250] sm:$0xff] }
  0x60   : > { %v451_v40 = vadd.f32 %v1057_v5, %v322_v29  ;;  %v452_v41 = vadd.f32 %v1057_v5, %v323_v30  ;;  %v327_v42 = vmul.f32 %v1052_v1, %v198_v26  ;;  %577 = vst [vmem:[%s1086_s22 + $0x178] sm:$0xff] %v449_v32  ;;  %v453_v46 = vadd.f32 %v1057_v5, %v324_v33  ;;  %v219_v29 = vld [vmem:[%s1045_s7 + $0x258] sm:$0xff]  ;;  %v220_v30 = vld [vmem:[%s1045_s7 + $0x260] sm:$0xff] }
  0x61   : > { %v454_v47 = vadd.f32 %v1057_v5, %v325_v34  ;;  %v455_v48 = vadd.f32 %v1057_v5, %v326_v35  ;;  %v328_v49 = vmul.f32 %v1052_v1, %v199_v31  ;;  %578 = vst [vmem:[%s1086_s22 + $0x180] sm:$0xff] %v450_v39  ;;  %v329_v52 = vmul.f32 %v1052_v1, %v200_v36  ;;  %v221_v31 = vld [vmem:[%s1045_s7 + $0x268] sm:$0xff]  ;;  %v222_v36 = vld [vmem:[%s1045_s7 + $0x270] sm:$0xff] }
  0x62   : > { %579 = vst [vmem:[%s1086_s22 + $0x188] sm:$0xff] %v451_v40  ;;  %580 = vst [vmem:[%s1086_s22 + $0x190] sm:$0xff] %v452_v41  ;;  %v456_v51 = vadd.f32 %v1057_v5, %v327_v42  ;;  %v330_v53 = vmul.f32 %v1052_v1, %v201_v37  ;;  %v331_v54 = vmul.f32 %v1052_v1, %v202_v38  ;;  %v223_v41 = vld [vmem:[%s1045_s7 + $0x278] sm:$0xff] }
  0x63   : > { %581 = vst [vmem:[%s1086_s22 + $0x198] sm:$0xff] %v453_v46  ;;  %582 = vst [vmem:[%s1086_s22 + $0x1a0] sm:$0xff] %v454_v47  ;;  %v457_v56 = vadd.f32 %v1057_v5, %v328_v49  ;;  %v332_v57 = vmul.f32 %v1052_v1, %v203_v43  ;;  %v333_v58 = vmul.f32 %v1052_v1, %v204_v44  ;;  %v224_v46 = vld [vmem:[%s1045_s7 + $0x280] sm:$0xff]  ;;  %v225_v47 = vld [vmem:[%s1045_s7 + $0x288] sm:$0xff] }
  0x64   : > { %583 = vst [vmem:[%s1086_s22 + $0x1a8] sm:$0xff] %v455_v48  ;;  %v334_v59 = vmul.f32 %v1052_v1, %v205_v45  ;;  %584 = vst [vmem:[%s1086_s22 + $0x1b0] sm:$0xff] %v456_v51  ;;  %v458_v63 = vadd.f32 %v1057_v5, %v329_v52  ;;  %v459_v0 = vadd.f32 %v1057_v5, %v330_v53  ;;  %v226_v48 = vld [vmem:[%s1045_s7 + $0x290] sm:$0xff]  ;;  %v227_v53 = vld [vmem:[%s1045_s7 + $0x298] sm:$0xff] }
  0x65   : > { %v460_v2 = vadd.f32 %v1057_v5, %v331_v54  ;;  %v335_v3 = vmul.f32 %v1052_v1, %v206_v50  ;;  %585 = vst [vmem:[%s1086_s22 + $0x1b8] sm:$0xff] %v457_v56  ;;  %v461_v8 = vadd.f32 %v1057_v5, %v332_v57  ;;  %v462_v9 = vadd.f32 %v1057_v5, %v333_v58  ;;  %v228_v54 = vld [vmem:[%s1045_s7 + $0x2a0] sm:$0xff] }
  0x66   : > { %v463_v10 = vadd.f32 %v1057_v5, %v334_v59  ;;  %v336_v11 = vmul.f32 %v1052_v1, %v207_v55  ;;  %586 = vst [vmem:[%s1086_s22 + $0x1c0] sm:$0xff] %v458_v63  ;;  %587 = vst [vmem:[%s1086_s22 + $0x1c8] sm:$0xff] %v459_v0  ;;  %v337_v14 = vmul.f32 %v1052_v1, %v208_v60  ;;  %v229_v55 = vld [vmem:[%s1045_s7 + $0x2a8] sm:$0xff]  ;;  %v230_v60 = vld [vmem:[%s1045_s7 + $0x2b0] sm:$0xff] }
  0x67   : > { %588 = vst [vmem:[%s1086_s22 + $0x1d0] sm:$0xff] %v460_v2  ;;  %v464_v13 = vadd.f32 %v1057_v5, %v335_v3  ;;  %v338_v15 = vmul.f32 %v1052_v1, %v209_v61  ;;  %v339_v16 = vmul.f32 %v1052_v1, %v210_v62  ;;  %589 = vst [vmem:[%s1086_s22 + $0x1d8] sm:$0xff] %v461_v8  ;;  %v231_v2 = vld [vmem:[%s1045_s7 + $0x2b8] sm:$0xff]  ;;  %v232_v8 = vld [vmem:[%s1045_s7 + $0x2c0] sm:$0xff] }
  0x68   : > { %590 = vst [vmem:[%s1086_s22 + $0x1e0] sm:$0xff] %v462_v9  ;;  %591 = vst [vmem:[%s1086_s22 + $0x1e8] sm:$0xff] %v463_v10  ;;  %v465_v18 = vadd.f32 %v1057_v5, %v336_v11  ;;  %v340_v19 = vmul.f32 %v1052_v1, %v211_v4  ;;  %v341_v20 = vmul.f32 %v1052_v1, %v212_v6  ;;  %v233_v9 = vld [vmem:[%s1045_s7 + $0x2c8] sm:$0xff]  ;;  %v234_v10 = vld [vmem:[%s1045_s7 + $0x2d0] sm:$0xff] }
  0x69   : > { %v342_v21 = vmul.f32 %v1052_v1, %v213_v7  ;;  %592 = vst [vmem:[%s1086_s22 + $0x1f0] sm:$0xff] %v464_v13  ;;  %v466_v25 = vadd.f32 %v1057_v5, %v337_v14  ;;  %v467_v26 = vadd.f32 %v1057_v5, %v338_v15  ;;  %v468_v27 = vadd.f32 %v1057_v5, %v339_v16  ;;  %v235_v15 = vld [vmem:[%s1045_s7 + $0x2d8] sm:$0xff]  ;;  %v236_v16 = vld [vmem:[%s1045_s7 + $0x2e0] sm:$0xff] }
  0x6a   : > { %v343_v28 = vmul.f32 %v1052_v1, %v214_v12  ;;  %593 = vst [vmem:[%s1086_s22 + $0x1f8] sm:$0xff] %v465_v18  ;;  %v469_v32 = vadd.f32 %v1057_v5, %v340_v19  ;;  %v470_v33 = vadd.f32 %v1057_v5, %v341_v20  ;;  %v344_v35 = vmul.f32 %v1052_v1, %v215_v17  ;;  %v237_v17 = vld [vmem:[%s1045_s7 + $0x2e8] sm:$0xff] }
  0x6b   : > { %v471_v34 = vadd.f32 %v1057_v5, %v342_v21  ;;  %594 = vst [vmem:[%s1086_s22 + $0x200] sm:$0xff] %v466_v25  ;;  %595 = vst [vmem:[%s1086_s22 + $0x208] sm:$0xff] %v467_v26  ;;  %v345_v38 = vmul.f32 %v1052_v1, %v216_v22  ;;  %v346_v39 = vmul.f32 %v1052_v1, %v217_v23  ;;  %v238_v22 = vld [vmem:[%s1045_s7 + $0x2f0] sm:$0xff] }
  0x6c   : > { %596 = vst [vmem:[%s1086_s22 + $0x210] sm:$0xff] %v468_v27  ;;  %v472_v37 = vadd.f32 %v1057_v5, %v343_v28  ;;  %v347_v40 = vmul.f32 %v1052_v1, %v218_v24  ;;  %597 = vst [vmem:[%s1086_s22 + $0x218] sm:$0xff] %v469_v32  ;;  %v473_v42 = vadd.f32 %v1057_v5, %v344_v35  ;;  %v239_v27 = vld [vmem:[%s1045_s7 + $0x2f8] sm:$0xff]  ;;  %v240_v32 = vld [vmem:[%s1045_s7 + $0x300] sm:$0xff] }
  0x6d   : > { %598 = vst [vmem:[%s1086_s22 + $0x220] sm:$0xff] %v470_v33  ;;  %599 = vst [vmem:[%s1086_s22 + $0x228] sm:$0xff] %v471_v34  ;;  %v348_v43 = vmul.f32 %v1052_v1, %v219_v29  ;;  %v349_v44 = vmul.f32 %v1052_v1, %v220_v30  ;;  %v350_v45 = vmul.f32 %v1052_v1, %v221_v31  ;;  %v241_v33 = vld [vmem:[%s1045_s7 + $0x308] sm:$0xff]  ;;  %v242_v34 = vld [vmem:[%s1045_s7 + $0x310] sm:$0xff] }
  0x6e   : > { %600 = vst [vmem:[%s1086_s22 + $0x230] sm:$0xff] %v472_v37  ;;  %v474_v49 = vadd.f32 %v1057_v5, %v345_v38  ;;  %v475_v50 = vadd.f32 %v1057_v5, %v346_v39  ;;  %v476_v51 = vadd.f32 %v1057_v5, %v347_v40  ;;  %v351_v52 = vmul.f32 %v1052_v1, %v222_v36  ;;  %v243_v39 = vld [vmem:[%s1045_s7 + $0x318] sm:$0xff]  ;;  %v244_v40 = vld [vmem:[%s1045_s7 + $0x320] sm:$0xff] }
  0x6f   : > { %601 = vst [vmem:[%s1086_s22 + $0x238] sm:$0xff] %v473_v42  ;;  %v477_v56 = vadd.f32 %v1057_v5, %v348_v43  ;;  %v478_v57 = vadd.f32 %v1057_v5, %v349_v44  ;;  %v479_v58 = vadd.f32 %v1057_v5, %v350_v45  ;;  %v352_v59 = vmul.f32 %v1052_v1, %v223_v41  ;;  %v245_v41 = vld [vmem:[%s1045_s7 + $0x328] sm:$0xff] }
  0x70   : > { %602 = vst [vmem:[%s1086_s22 + $0x240] sm:$0xff] %v474_v49  ;;  %603 = vst [vmem:[%s1086_s22 + $0x248] sm:$0xff] %v475_v50  ;;  %v480_v61 = vadd.f32 %v1057_v5, %v351_v52  ;;  %v353_v62 = vmul.f32 %v1052_v1, %v224_v46  ;;  %v354_v63 = vmul.f32 %v1052_v1, %v225_v47  ;;  %v246_v46 = vld [vmem:[%s1045_s7 + $0x330] sm:$0xff] }
  0x71   : > { %604 = vst [vmem:[%s1086_s22 + $0x250] sm:$0xff] %v476_v51  ;;  %v355_v0 = vmul.f32 %v1052_v1, %v226_v48  ;;  %605 = vst [vmem:[%s1086_s22 + $0x258] sm:$0xff] %v477_v56  ;;  %v481_v3 = vadd.f32 %v1057_v5, %v352_v59  ;;  %v356_v4 = vmul.f32 %v1052_v1, %v227_v53  ;;  %v247_v51 = vld [vmem:[%s1045_s7 + $0x338] sm:$0xff]  ;;  %v248_v56 = vld [vmem:[%s1045_s7 + $0x340] sm:$0xff] }
  0x72   : > { %606 = vst [vmem:[%s1086_s22 + $0x260] sm:$0xff] %v478_v57  ;;  %607 = vst [vmem:[%s1086_s22 + $0x268] sm:$0xff] %v479_v58  ;;  %v357_v6 = vmul.f32 %v1052_v1, %v228_v54  ;;  %v358_v7 = vmul.f32 %v1052_v1, %v229_v55  ;;  %v482_v11 = vadd.f32 %v1057_v5, %v353_v62  ;;  %v249_v57 = vld [vmem:[%s1045_s7 + $0x348] sm:$0xff]  ;;  %v250_v58 = vld [vmem:[%s1045_s7 + $0x350] sm:$0xff] }
  0x73   : > { %608 = vst [vmem:[%s1086_s22 + $0x270] sm:$0xff] %v480_v61  ;;  %v483_v12 = vadd.f32 %v1057_v5, %v354_v63  ;;  %v484_v13 = vadd.f32 %v1057_v5, %v355_v0  ;;  %v359_v14 = vmul.f32 %v1052_v1, %v230_v60  ;;  %609 = vst [vmem:[%s1086_s22 + $0x278] sm:$0xff] %v481_v3  ;;  %v251_v63 = vld [vmem:[%s1045_s7 + $0x358] sm:$0xff]  ;;  %v252_v0 = vld [vmem:[%s1045_s7 + $0x360] sm:$0xff] }
  0x74   : > { %v485_v18 = vadd.f32 %v1057_v5, %v356_v4  ;;  %v486_v19 = vadd.f32 %v1057_v5, %v357_v6  ;;  %v487_v20 = vadd.f32 %v1057_v5, %v358_v7  ;;  %v360_v21 = vmul.f32 %v1052_v1, %v231_v2  ;;  %610 = vst [vmem:[%s1086_s22 + $0x280] sm:$0xff] %v482_v11  ;;  %v253_v2 = vld [vmem:[%s1045_s7 + $0x368] sm:$0xff] }
  0x75   : > { %611 = vst [vmem:[%s1086_s22 + $0x288] sm:$0xff] %v483_v12  ;;  %612 = vst [vmem:[%s1086_s22 + $0x290] sm:$0xff] %v484_v13  ;;  %v488_v23 = vadd.f32 %v1057_v5, %v359_v14  ;;  %v361_v24 = vmul.f32 %v1052_v1, %v232_v8  ;;  %v362_v25 = vmul.f32 %v1052_v1, %v233_v9  ;;  %v254_v8 = vld [vmem:[%s1045_s7 + $0x370] sm:$0xff]  ;;  %v255_v13 = vld [vmem:[%s1045_s7 + $0x378] sm:$0xff] }
  0x76   : > { %v363_v26 = vmul.f32 %v1052_v1, %v234_v10  ;;  %613 = vst [vmem:[%s1086_s22 + $0x298] sm:$0xff] %v485_v18  ;;  %614 = vst [vmem:[%s1086_s22 + $0x2a0] sm:$0xff] %v486_v19  ;;  %v489_v28 = vadd.f32 %v1057_v5, %v360_v21  ;;  %v364_v29 = vmul.f32 %v1052_v1, %v235_v15  ;;  %v256_v18 = vld [vmem:[%s1045_s7 + $0x380] sm:$0xff]  ;;  %v257_v19 = vld [vmem:[%s1045_s7 + $0x388] sm:$0xff] }
  0x77   : > { %615 = vst [vmem:[%s1086_s22 + $0x2a8] sm:$0xff] %v487_v20  ;;  %v365_v30 = vmul.f32 %v1052_v1, %v236_v16  ;;  %v366_v31 = vmul.f32 %v1052_v1, %v237_v17  ;;  %616 = vst [vmem:[%s1086_s22 + $0x2b0] sm:$0xff] %v488_v23  ;;  %v490_v35 = vadd.f32 %v1057_v5, %v361_v24  ;;  %v258_v20 = vld [vmem:[%s1045_s7 + $0x390] sm:$0xff] }
  0x78   : > { %v491_v36 = vadd.f32 %v1057_v5, %v362_v25  ;;  %v492_v37 = vadd.f32 %v1057_v5, %v363_v26  ;;  %v367_v38 = vmul.f32 %v1052_v1, %v238_v22  ;;  %617 = vst [vmem:[%s1086_s22 + $0x2b8] sm:$0xff] %v489_v28  ;;  %v493_v42 = vadd.f32 %v1057_v5, %v364_v29  ;;  %v259_v25 = vld [vmem:[%s1045_s7 + $0x398] sm:$0xff]  ;;  %v260_v26 = vld [vmem:[%s1045_s7 + $0x3a0] sm:$0xff] }
  0x79   : > { %v494_v43 = vadd.f32 %v1057_v5, %v365_v30  ;;  %v495_v44 = vadd.f32 %v1057_v5, %v366_v31  ;;  %v368_v45 = vmul.f32 %v1052_v1, %v239_v27  ;;  %618 = vst [vmem:[%s1086_s22 + $0x2c0] sm:$0xff] %v490_v35  ;;  %v369_v48 = vmul.f32 %v1052_v1, %v240_v32  ;;  %v261_v27 = vld [vmem:[%s1045_s7 + $0x3a8] sm:$0xff]  ;;  %v262_v32 = vld [vmem:[%s1045_s7 + $0x3b0] sm:$0xff] }
  0x7a   : > { %619 = vst [vmem:[%s1086_s22 + $0x2c8] sm:$0xff] %v491_v36  ;;  %620 = vst [vmem:[%s1086_s22 + $0x2d0] sm:$0xff] %v492_v37  ;;  %v496_v47 = vadd.f32 %v1057_v5, %v367_v38  ;;  %v370_v49 = vmul.f32 %v1052_v1, %v241_v33  ;;  %v371_v50 = vmul.f32 %v1052_v1, %v242_v34  ;;  %v263_v37 = vld [vmem:[%s1045_s7 + $0x3b8] sm:$0xff] }
  0x7b   : > { %621 = vst [vmem:[%s1086_s22 + $0x2d8] sm:$0xff] %v493_v42  ;;  %622 = vst [vmem:[%s1086_s22 + $0x2e0] sm:$0xff] %v494_v43  ;;  %v497_v52 = vadd.f32 %v1057_v5, %v368_v45  ;;  %v372_v53 = vmul.f32 %v1052_v1, %v243_v39  ;;  %v373_v54 = vmul.f32 %v1052_v1, %v244_v40  ;;  %v264_v42 = vld [vmem:[%s1045_s7 + $0x3c0] sm:$0xff]  ;;  %v265_v43 = vld [vmem:[%s1045_s7 + $0x3c8] sm:$0xff] }
  0x7c   : > { %623 = vst [vmem:[%s1086_s22 + $0x2e8] sm:$0xff] %v495_v44  ;;  %v374_v55 = vmul.f32 %v1052_v1, %v245_v41  ;;  %624 = vst [vmem:[%s1086_s22 + $0x2f0] sm:$0xff] %v496_v47  ;;  %v498_v59 = vadd.f32 %v1057_v5, %v369_v48  ;;  %v499_v60 = vadd.f32 %v1057_v5, %v370_v49  ;;  %v266_v44 = vld [vmem:[%s1045_s7 + $0x3d0] sm:$0xff]  ;;  %v267_v49 = vld [vmem:[%s1045_s7 + $0x3d8] sm:$0xff] }
  0x7d   : > { %v500_v61 = vadd.f32 %v1057_v5, %v371_v50  ;;  %v375_v62 = vmul.f32 %v1052_v1, %v246_v46  ;;  %625 = vst [vmem:[%s1086_s22 + $0x2f8] sm:$0xff] %v497_v52  ;;  %v501_v3 = vadd.f32 %v1057_v5, %v372_v53  ;;  %v502_v4 = vadd.f32 %v1057_v5, %v373_v54  ;;  %v268_v50 = vld [vmem:[%s1045_s7 + $0x3e0] sm:$0xff] }
  0x7e   : > { %v503_v6 = vadd.f32 %v1057_v5, %v374_v55  ;;  %v376_v7 = vmul.f32 %v1052_v1, %v247_v51  ;;  %626 = vst [vmem:[%s1086_s22 + $0x300] sm:$0xff] %v498_v59  ;;  %627 = vst [vmem:[%s1086_s22 + $0x308] sm:$0xff] %v499_v60  ;;  %v377_v10 = vmul.f32 %v1052_v1, %v248_v56  ;;  %v269_v51 = vld [vmem:[%s1045_s7 + $0x3e8] sm:$0xff]  ;;  %v270_v56 = vld [vmem:[%s1045_s7 + $0x3f0] sm:$0xff] }
  0x7f   : > { %628 = vst [vmem:[%s1086_s22 + $0x310] sm:$0xff] %v500_v61  ;;  %v504_v9 = vadd.f32 %v1057_v5, %v375_v62  ;;  %v378_v11 = vmul.f32 %v1052_v1, %v249_v57  ;;  %v379_v12 = vmul.f32 %v1052_v1, %v250_v58  ;;  %629 = vst [vmem:[%s1086_s22 + $0x318] sm:$0xff] %v501_v3  ;;  %v271_v61 = vld [vmem:[%s1045_s7 + $0x3f8] sm:$0xff] }
  0x80   : > { %630 = vst [vmem:[%s1086_s22 + $0x320] sm:$0xff] %v502_v4  ;;  %631 = vst [vmem:[%s1086_s22 + $0x328] sm:$0xff] %v503_v6  ;;  %v505_v14 = vadd.f32 %v1057_v5, %v376_v7  ;;  %v380_v15 = vmul.f32 %v1052_v1, %v251_v63  ;;  %v381_v16 = vmul.f32 %v1052_v1, %v252_v0 }
  0x81   : > { %v382_v17 = vmul.f32 %v1052_v1, %v253_v2  ;;  %632 = vst [vmem:[%s1086_s22 + $0x330] sm:$0xff] %v504_v9  ;;  %v506_v21 = vadd.f32 %v1057_v5, %v377_v10  ;;  %v507_v22 = vadd.f32 %v1057_v5, %v378_v11  ;;  %v508_v23 = vadd.f32 %v1057_v5, %v379_v12 }
  0x82   : > { %v383_v24 = vmul.f32 %v1052_v1, %v254_v8  ;;  %633 = vst [vmem:[%s1086_s22 + $0x338] sm:$0xff] %v505_v14  ;;  %v509_v28 = vadd.f32 %v1057_v5, %v380_v15  ;;  %v510_v29 = vadd.f32 %v1057_v5, %v381_v16  ;;  %v384_v31 = vmul.f32 %v1052_v1, %v255_v13 }
  0x83   : > { %v511_v30 = vadd.f32 %v1057_v5, %v382_v17  ;;  %634 = vst [vmem:[%s1086_s22 + $0x340] sm:$0xff] %v506_v21  ;;  %635 = vst [vmem:[%s1086_s22 + $0x348] sm:$0xff] %v507_v22  ;;  %v385_v34 = vmul.f32 %v1052_v1, %v256_v18  ;;  %v386_v35 = vmul.f32 %v1052_v1, %v257_v19 }
  0x84   : > { %636 = vst [vmem:[%s1086_s22 + $0x350] sm:$0xff] %v508_v23  ;;  %v512_v33 = vadd.f32 %v1057_v5, %v383_v24  ;;  %v387_v36 = vmul.f32 %v1052_v1, %v258_v20  ;;  %637 = vst [vmem:[%s1086_s22 + $0x358] sm:$0xff] %v509_v28  ;;  %v513_v38 = vadd.f32 %v1057_v5, %v384_v31 }
  0x85   : > { %638 = vst [vmem:[%s1086_s22 + $0x360] sm:$0xff] %v510_v29  ;;  %639 = vst [vmem:[%s1086_s22 + $0x368] sm:$0xff] %v511_v30  ;;  %v388_v39 = vmul.f32 %v1052_v1, %v259_v25  ;;  %v389_v40 = vmul.f32 %v1052_v1, %v260_v26  ;;  %v390_v41 = vmul.f32 %v1052_v1, %v261_v27 }
  0x86   : > { %640 = vst [vmem:[%s1086_s22 + $0x370] sm:$0xff] %v512_v33  ;;  %v514_v45 = vadd.f32 %v1057_v5, %v385_v34  ;;  %v515_v46 = vadd.f32 %v1057_v5, %v386_v35  ;;  %v516_v47 = vadd.f32 %v1057_v5, %v387_v36  ;;  %v391_v48 = vmul.f32 %v1052_v1, %v262_v32 }
  0x87   : > { %641 = vst [vmem:[%s1086_s22 + $0x378] sm:$0xff] %v513_v38  ;;  %v517_v52 = vadd.f32 %v1057_v5, %v388_v39  ;;  %v518_v53 = vadd.f32 %v1057_v5, %v389_v40  ;;  %v519_v54 = vadd.f32 %v1057_v5, %v390_v41  ;;  %v392_v55 = vmul.f32 %v1052_v1, %v263_v37 }
  0x88   : > { %642 = vst [vmem:[%s1086_s22 + $0x380] sm:$0xff] %v514_v45  ;;  %643 = vst [vmem:[%s1086_s22 + $0x388] sm:$0xff] %v515_v46  ;;  %v520_v57 = vadd.f32 %v1057_v5, %v391_v48  ;;  %v393_v58 = vmul.f32 %v1052_v1, %v264_v42  ;;  %v394_v59 = vmul.f32 %v1052_v1, %v265_v43 }
  0x89   : > { %644 = vst [vmem:[%s1086_s22 + $0x390] sm:$0xff] %v516_v47  ;;  %v395_v60 = vmul.f32 %v1052_v1, %v266_v44  ;;  %645 = vst [vmem:[%s1086_s22 + $0x398] sm:$0xff] %v517_v52  ;;  %v521_v62 = vadd.f32 %v1057_v5, %v392_v55  ;;  %v396_v63 = vmul.f32 %v1052_v1, %v267_v49 }
  0x8a   : > { %646 = vst [vmem:[%s1086_s22 + $0x3a0] sm:$0xff] %v518_v53  ;;  %647 = vst [vmem:[%s1086_s22 + $0x3a8] sm:$0xff] %v519_v54  ;;  %v397_v0 = vmul.f32 %v1052_v1, %v268_v50  ;;  %v398_v2 = vmul.f32 %v1052_v1, %v269_v51  ;;  %v522_v3 = vadd.f32 %v1057_v5, %v393_v58 }
  0x8b   : > { %648 = vst [vmem:[%s1086_s22 + $0x3b0] sm:$0xff] %v520_v57  ;;  %v523_v4 = vadd.f32 %v1057_v5, %v394_v59  ;;  %v524_v6 = vadd.f32 %v1057_v5, %v395_v60  ;;  %v399_v7 = vmul.f32 %v1052_v1, %v270_v56  ;;  %649 = vst [vmem:[%s1086_s22 + $0x3b8] sm:$0xff] %v521_v62 }
  0x8c   : > { %v525_v8 = vadd.f32 %v1057_v5, %v396_v63  ;;  %v526_v9 = vadd.f32 %v1057_v5, %v397_v0  ;;  %v527_v10 = vadd.f32 %v1057_v5, %v398_v2  ;;  %v400_v11 = vmul.f32 %v1052_v1, %v271_v61  ;;  %650 = vst [vmem:[%s1086_s22 + $0x3c0] sm:$0xff] %v522_v3 }
  0x8d   : > { %651 = vst [vmem:[%s1086_s22 + $0x3c8] sm:$0xff] %v523_v4  ;;  %652 = vst [vmem:[%s1086_s22 + $0x3d0] sm:$0xff] %v524_v6  ;;  %v528_v12 = vadd.f32 %v1057_v5, %v399_v7 }
  0x8e   : > { %653 = vst [vmem:[%s1086_s22 + $0x3d8] sm:$0xff] %v525_v8  ;;  %654 = vst [vmem:[%s1086_s22 + $0x3e0] sm:$0xff] %v526_v9  ;;  %v529_v13 = vadd.f32 %v1057_v5, %v400_v11 }
  0x8f   : > { %655 = vst [vmem:[%s1086_s22 + $0x3e8] sm:$0xff] %v527_v10  ;;  %656 = vst [vmem:[%s1086_s22 + $0x3f0] sm:$0xff] %v528_v12 }
  0x90   : > { %657 = vst [vmem:[%s1086_s22 + $0x3f8] sm:$0xff] %v529_v13 }
  0x91   : > { %862 = shalt.err (!%p859_p10)
}
  0x92   : > { %s863_s21 = scalar_lea.hbm %s1570_s9, 16384  ;;  %s867_s27 = scalar_lea.hbm %s1623_s2, 32768 }
  0x93   : > { %p864_p0 = scmp.ne.s32.totalorder %s1570_s9, %s863_s21  ;;  %p868_p1 = scmp.lt.s32.totalorder %s1570_s9, %s1623_s2 }
  0x94   : > { %p869_p3 = scmp.lt.s32.totalorder %s867_s27, %s863_s21 }
  0x95   : > { %p865_p2 = pnand %p864_p0, %p1632_p12 }
  0x96   : > { %p870_p6 = por %p869_p3, %p868_p1 }
  0x97   : > { %p866_p9 = pneg %p865_p2 }
  0x99   : > { %p871_p11 = pnand %p870_p6, %p866_p9 }
  0x9b   : > { %874 = shalt.err (!%p871_p11)
}
  0x9c   : > { %s922_s7 = smov 128   ;;  %s923_s30 = smov 8  }
  0x9d   : > { %764 = dma.vmem_to_hbm [thread:$0]  (%p1632_p12), %s1576_s6, 16384, %s1570_s9, %s659_s10, %s922_s7, %s922_s7, %s923_s30  }
  0x9e PF: > { %s687_s4 = sand.u32 1, %s903_s12   ;;  %p1633_p13 = scmp.ne.s32.totalorder %s1629_s24, 0 }
  0x9f   : > { %p1634_p4 = scmp.ge.s32.totalorder %s915_s15, 2  ;;  %s688_s22 = scalar_lea.sflag [#allocation6], %s687_s4 }
  0xa1   : > { %p771_p5 = pnand %p1634_p4, %p1633_p13 }
  0xa3   : > { %p772_p7 = pneg %p771_p5 }
  0xa5   : > { %898 = dma.done.wait (%p772_p7), %s688_s22, 16384  }
  0xa6   : > { %900 = vsyncadd (%p772_p7), %s688_s22, 4294950912  ;;  %p19_p8 = scmp.ge.s32.totalorder %s967_s17, 4   ;;  %s1635_s12 = smov %s907_s13 }
  0xa7   : > { %s1636_s13 = smov %s911_s14  ;;  %s1637_s14 = smov %s979_s20 }
  0xa8   : > { %s1638_s15 = smov %s967_s17  ;;  %21 = sbr.rel (!%p19_p8) target bundleno = 10 (0xa), region = 69 }
  0xad   :  { %693 = vsyncpa [#allocation5], 1 }
  0xae   :  { %695 = vsyncpa [#allocation5 + $0x1], 1 }
  0xaf   :  { %696 = vsyncpa [#allocation6], 1 }
  0xb0   :  { %698 = vsyncpa [#allocation6 + $0x1], 1 }

</bundles_post_ra>
